<compile_context>
chip_gen: v6e
topology: v6e:2x2x1
jax: 0.10.0
libtpu: 0.0.40
codegen_flags: <defaults>
</compile_context>

<pallas_src>
import functools

import jax
import jax.numpy as jnp
from jax.experimental import pallas as pl
from jax.experimental.pallas import tpu as pltpu

EPS = 1e-5                       # torch.nn.LayerNorm default eps
LANE = 128                       # TPU lane width
ROW_CHUNK = 256                  # rows per inner chunk in the fused kernel
_VMEM_CAP = 48 * 1024 * 1024     # conservative scoped-VMEM ceiling (safe on v7x's 64 MiB)
_FUSED_MAX_BYTES = 40 * 1024 * 1024  # switch to the tiled 2-pass path above this budget


def _round_up(n, m):
    return ((n + m - 1) // m) * m


def _pick_chunk(l, cp):
    # Keep one f32 row-chunk around <= ~1 MiB; prefer multiples of 8 rows.
    chunk = min(l, ROW_CHUNK, max(8, (1 << 20) // (cp * 4)))
    if chunk >= 8:
        chunk = (chunk // 8) * 8
    return max(chunk, 1)


# -----------------------------------------------------------------------------
# Fused single-pass path: grid over batch, full (L, Cp) slab per step,
# intermediates bounded by an in-kernel row-chunk loop.
# -----------------------------------------------------------------------------
def _fused_kernel(x_ref, gamma_ref, beta_ref, o_ref, colsum_ref,
                  *, c_real, l_real, chunk):
    # x_ref, o_ref: (L, Cp); gamma_ref, beta_ref: (1, Cp); colsum_ref: (1, Cp) f32 scratch
    gamma = gamma_ref[...].astype(jnp.float32)
    beta = beta_ref[...].astype(jnp.float32)
    colsum_ref[...] = jnp.zeros_like(colsum_ref)

    inv_c = jnp.float32(1.0 / c_real)

    def ln_rows(row0, nrows):
        x = x_ref[pl.ds(row0, nrows), :].astype(jnp.float32)
        mean = jnp.sum(x, axis=-1, keepdims=True) * inv_c
        msq = jnp.sum(x * x, axis=-1, keepdims=True) * inv_c
        var = jnp.maximum(msq - mean * mean, 0.0)
        x_hat = (x - mean) * jax.lax.rsqrt(var + EPS) * gamma + beta
        colsum_ref[...] += jnp.sum(x_hat, axis=0, keepdims=True)
        o_ref[pl.ds(row0, nrows), :] = x_hat.astype(o_ref.dtype)

    n_full = l_real // chunk
    tail = l_real % chunk

    if n_full > 0:
        def body(i, carry):
            ln_rows(pl.multiple_of(i * chunk, chunk), chunk)
            return carry
        jax.lax.fori_loop(0, n_full, body, 0)
    if tail > 0:
        ln_rows(n_full * chunk, tail)

    seq_mean = colsum_ref[...] * jnp.float32(1.0 / l_real)

    def sub_rows(row0, nrows):
        y = o_ref[pl.ds(row0, nrows), :].astype(jnp.float32) - seq_mean
        o_ref[pl.ds(row0, nrows), :] = y.astype(o_ref.dtype)

    if n_full > 0:
        def body2(i, carry):
            sub_rows(pl.multiple_of(i * chunk, chunk), chunk)
            return carry
        jax.lax.fori_loop(0, n_full, body2, 0)
    if tail > 0:
        sub_rows(n_full * chunk, tail)


def _fused_call(x, gamma2d, beta2d, *, c_real, vmem_limit):
    B, L, Cp = x.shape
    chunk = _pick_chunk(L, Cp)
    kernel = functools.partial(_fused_kernel, c_real=c_real, l_real=L, chunk=chunk)

    return pl.pallas_call(
        kernel,
        out_shape=jax.ShapeDtypeStruct((B, L, Cp), x.dtype),
        grid_spec=pltpu.PrefetchScalarGridSpec(
            num_scalar_prefetch=0,
            grid=(B,),
            in_specs=[
                pl.BlockSpec((pl.Squeezed(), L, Cp), lambda b: (b, 0, 0)),
                pl.BlockSpec((1, Cp), lambda b: (0, 0)),
                pl.BlockSpec((1, Cp), lambda b: (0, 0)),
            ],
            out_specs=pl.BlockSpec((pl.Squeezed(), L, Cp), lambda b: (b, 0, 0)),
            scratch_shapes=[pltpu.VMEM((1, Cp), jnp.float32)],
        ),
        compiler_params=pltpu.CompilerParams(
            dimension_semantics=("parallel",),
            vmem_limit_bytes=int(vmem_limit),
        ),
    )(x, gamma2d, beta2d)


# -----------------------------------------------------------------------------
# Fallback path for large L*C: two-pass, L tiled on the grid.
#   pass 1: per-tile layernorm -> x_hat, plus per-batch (1, Cp) column-sum accumulator
#   pass 2: subtract seq mean tile-by-tile
# -----------------------------------------------------------------------------
def _tiled_pass1_kernel(x_ref, gamma_ref, beta_ref, xhat_ref, colsum_ref,
                        *, c_real, l_real, tile_l):
    lt = pl.program_id(1)

    @pl.when(lt == 0)
    def _():
        colsum_ref[...] = jnp.zeros_like(colsum_ref)

    gamma = gamma_ref[...].astype(jnp.float32)
    beta = beta_ref[...].astype(jnp.float32)
    x = x_ref[...].astype(jnp.float32)

    inv_c = jnp.float32(1.0 / c_real)
    mean = jnp.sum(x, axis=-1, keepdims=True) * inv_c
    msq = jnp.sum(x * x, axis=-1, keepdims=True) * inv_c
    var = jnp.maximum(msq - mean * mean, 0.0)
    x_hat = (x - mean) * jax.lax.rsqrt(var + EPS) * gamma + beta

    # Mask rows that are L-padding so they don't pollute the sequence mean.
    row_ids = lt * tile_l + jax.lax.broadcasted_iota(jnp.int32, x.shape, 0)
    contrib = jnp.where(row_ids < l_real, x_hat, 0.0)
    colsum_ref[...] += jnp.sum(contrib, axis=0, keepdims=True)

    xhat_ref[...] = x_hat.astype(xhat_ref.dtype)


def _tiled_pass2_kernel(xhat_ref, colsum_ref, o_ref, *, l_real):
    seq_mean = colsum_ref[...] * jnp.float32(1.0 / l_real)
    o_ref[...] = (xhat_ref[...].astype(jnp.float32) - seq_mean).astype(o_ref.dtype)


def _tiled_call(x, gamma2d, beta2d, *, c_real, l_real):
    B, L, Cp = x.shape
    itemsize = x.dtype.itemsize

    # Tile rows so one f32 tile is ~2 MiB; never bigger than the (8-rounded) sequence.
    tile_l = min(1024, max(8, (2 << 20) // (Cp * 4)))
    tile_l = max(8, (tile_l // 8) * 8)
    tile_l = min(tile_l, _round_up(L, 8))

    Lp = _round_up(L, tile_l)
    if Lp != L:
        x = jnp.pad(x, ((0, 0), (0, Lp - L), (0, 0)))
    n_lt = Lp // tile_l

    tile_bytes = tile_l * Cp * itemsize
    tile_f32 = tile_l * Cp * 4
    vmem_limit = int(min(_VMEM_CAP, max(4 * tile_bytes + 6 * tile_f32 + (2 << 20),
                                        24 << 20)))

    p1 = functools.partial(_tiled_pass1_kernel, c_real=c_real, l_real=l_real,
                           tile_l=tile_l)
    x_hat, colsum = pl.pallas_call(
        p1,
        out_shape=(
            jax.ShapeDtypeStruct((B, Lp, Cp), x.dtype),
            jax.ShapeDtypeStruct((B, 1, Cp), jnp.float32),
        ),
        grid_spec=pltpu.PrefetchScalarGridSpec(
            num_scalar_prefetch=0,
            grid=(B, n_lt),
            in_specs=[
                pl.BlockSpec((pl.Squeezed(), tile_l, Cp), lambda b, lt: (b, lt, 0)),
                pl.BlockSpec((1, Cp), lambda b, lt: (0, 0)),
                pl.BlockSpec((1, Cp), lambda b, lt: (0, 0)),
            ],
            out_specs=[
                pl.BlockSpec((pl.Squeezed(), tile_l, Cp), lambda b, lt: (b, lt, 0)),
                pl.BlockSpec((pl.Squeezed(), 1, Cp), lambda b, lt: (b, 0, 0)),
            ],
        ),
        compiler_params=pltpu.CompilerParams(
            dimension_semantics=("parallel", "arbitrary"),
            vmem_limit_bytes=vmem_limit,
        ),
    )(x, gamma2d, beta2d)

    p2 = functools.partial(_tiled_pass2_kernel, l_real=l_real)
    out = pl.pallas_call(
        p2,
        out_shape=jax.ShapeDtypeStruct((B, Lp, Cp), x.dtype),
        grid_spec=pltpu.PrefetchScalarGridSpec(
            num_scalar_prefetch=0,
            grid=(B, n_lt),
            in_specs=[
                pl.BlockSpec((pl.Squeezed(), tile_l, Cp), lambda b, lt: (b, lt, 0)),
                pl.BlockSpec((pl.Squeezed(), 1, Cp), lambda b, lt: (b, 0, 0)),
            ],
            out_specs=pl.BlockSpec((pl.Squeezed(), tile_l, Cp), lambda b, lt: (b, lt, 0)),
        ),
        compiler_params=pltpu.CompilerParams(
            dimension_semantics=("parallel", "parallel"),
            vmem_limit_bytes=vmem_limit,
        ),
    )(x_hat, colsum)

    if Lp != L:
        out = out[:, :L, :]
    return out


# -----------------------------------------------------------------------------
# Public wrapper
# -----------------------------------------------------------------------------
def my_layernorm(x, gamma, beta, *, force_tiled=False):
    """x: (B, L, C); gamma, beta: (C,). Returns (B, L, C)."""
    B, L, C = x.shape
    Cp = _round_up(C, LANE)  # lane-dense channel dim

    gamma2d = gamma.reshape(1, C)
    beta2d = beta.reshape(1, C)
    if Cp != C:
        # Zero padding keeps the sums correct; real C is used as the denominator.
        x = jnp.pad(x, ((0, 0), (0, 0), (0, Cp - C)))
        gamma2d = jnp.pad(gamma2d, ((0, 0), (0, Cp - C)))
        beta2d = jnp.pad(beta2d, ((0, 0), (0, Cp - C)))

    itemsize = x.dtype.itemsize
    slab = L * Cp * itemsize
    chunk = _pick_chunk(L, Cp)
    fused_need = 4 * slab + 6 * chunk * Cp * 4 + (2 << 20)

    if (not force_tiled) and fused_need <= _FUSED_MAX_BYTES:
        vmem_limit = min(_VMEM_CAP, max(fused_need, 24 << 20))
        out = _fused_call(x, gamma2d, beta2d, c_real=C, vmem_limit=vmem_limit)
    else:
        out = _tiled_call(x, gamma2d, beta2d, c_real=C, l_real=L)

    if Cp != C:
        out = out[..., :C]
    return out


def _reference(x, gamma, beta):
    mean = jnp.mean(x, axis=-1, keepdims=True)
    var = jnp.mean((x - mean) ** 2, axis=-1, keepdims=True)
    x_hat = (x - mean) * jax.lax.rsqrt(var + EPS) * gamma + beta
    bias = jnp.mean(x_hat, axis=1, keepdims=True)
    return x_hat - bias


if __name__ == "__main__":
    B, L, C = 2, 8, 32  # batch, sequence length, channels

    key = jax.random.PRNGKey(0)
    x = jax.random.normal(key, (B, L, C), dtype=jnp.float32)

    # nn.LayerNorm default init: weight = ones, bias = zeros (deterministic)
    gamma = jnp.ones((C,), dtype=jnp.float32)
    beta = jnp.zeros((C,), dtype=jnp.float32)

    ref = _reference(x, gamma, beta)

    # Fused single-pass path (the one used for realistic Autoformer shapes).
    out = jax.block_until_ready(my_layernorm(x, gamma, beta))
    assert out.shape == (B, L, C)
    assert jnp.allclose(out, ref, atol=2e-5, rtol=2e-5), "fused path mismatch vs reference"

    # Exercise the large-slab fallback (L-tiled two-pass grid) for correctness too.
    out_tiled = jax.block_until_ready(my_layernorm(x, gamma, beta, force_tiled=True))
    assert out_tiled.shape == (B, L, C)
    assert jnp.allclose(out_tiled, ref, atol=2e-5, rtol=2e-5), "tiled path mismatch vs reference"

    print("KERNEL_OK")
</pallas_src>

<mosaic_0001>
module attributes {stable_mosaic.version = 11 : i64} {
  func.func @_fused_kernel(%arg0: i32, %arg1: memref<1x8x128xf32, #tpu.memory_space<vmem>>, %arg2: memref<1x128xf32, #tpu.memory_space<vmem>>, %arg3: memref<1x128xf32, #tpu.memory_space<vmem>>, %arg4: memref<1x8x128xf32, #tpu.memory_space<vmem>>, %arg5: memref<1x128xf32, #tpu.memory_space<vmem>>) attributes {dimension_semantics = [#tpu.dimension_semantics<parallel>], iteration_bounds = array<i64: 2>, scalar_prefetch = 0 : i64, scratch_operands = 1 : i64, tpu.core_type = #tpu.core_type<tc>, window_params = [{transform_indices = @transform_0, window_bounds = array<i64: 1, 8, 128>}, {pipeline_mode = #tpu.pipeline_mode<synchronous>, transform_indices = @transform_1, window_bounds = array<i64: 1, 128>}, {pipeline_mode = #tpu.pipeline_mode<synchronous>, transform_indices = @transform_2, window_bounds = array<i64: 1, 128>}, {transform_indices = @transform_3, window_bounds = array<i64: 1, 8, 128>}]} {
    %c0 = arith.constant 0 : index
    %c0_0 = arith.constant 0 : index
    %0 = vector.load %arg2[%c0, %c0_0] : memref<1x128xf32, #tpu.memory_space<vmem>>, vector<1x128xf32>
    %c0_1 = arith.constant 0 : index
    %c0_2 = arith.constant 0 : index
    %1 = vector.load %arg3[%c0_1, %c0_2] : memref<1x128xf32, #tpu.memory_space<vmem>>, vector<1x128xf32>
    %cst = arith.constant 0.000000e+00 : f32
    %2 = vector.broadcast %cst : f32 to vector<1x128xf32>
    %c0_3 = arith.constant 0 : index
    %c0_4 = arith.constant 0 : index
    %3 = vector.load %arg5[%c0_3, %c0_4] : memref<1x128xf32, #tpu.memory_space<vmem>>, vector<1x128xf32>
    tpu.vector_store %arg5[%c0_3, %c0_4], %2 {strides = array<i32>} : memref<1x128xf32, #tpu.memory_space<vmem>>, vector<1x128xf32>,
    %cst_5 = arith.constant 3.125000e-02 : f32
    %c0_i32 = arith.constant 0 : i32
    %c8_i32 = arith.constant 8 : i32
    %4 = arith.muli %c0_i32, %c8_i32 : i32
    %5 = tpu.assume_multiple %4, 8 : i32
    %c0_6 = arith.constant 0 : index
    %6 = arith.index_cast %5 : i32 to index
    %c0_7 = arith.constant 0 : index
    %7 = vector.load %arg1[%c0_6, %6, %c0_7] : memref<1x8x128xf32, #tpu.memory_space<vmem>>, vector<1x8x128xf32>
    %8 = vector.shape_cast %7 : vector<1x8x128xf32> to vector<8x128xf32>
    %cst_8 = arith.constant dense<0.000000e+00> : vector<8xf32>
    %9 = vector.multi_reduction <add>, %8, %cst_8 [1] : vector<8x128xf32> to vector<8xf32>
    %10 = vector.shape_cast %9 : vector<8xf32> to vector<8x1xf32>
    %11 = vector.broadcast %cst_5 : f32 to vector<8x1xf32>
    %12 = arith.mulf %10, %11 : vector<8x1xf32>
    %13 = arith.mulf %8, %8 : vector<8x128xf32>
    %cst_9 = arith.constant dense<0.000000e+00> : vector<8xf32>
    %14 = vector.multi_reduction <add>, %13, %cst_9 [1] : vector<8x128xf32> to vector<8xf32>
    %15 = vector.shape_cast %14 : vector<8xf32> to vector<8x1xf32>
    %16 = vector.broadcast %cst_5 : f32 to vector<8x1xf32>
    %17 = arith.mulf %15, %16 : vector<8x1xf32>
    %18 = arith.mulf %12, %12 : vector<8x1xf32>
    %19 = arith.subf %17, %18 : vector<8x1xf32>
    %cst_10 = arith.constant 0.000000e+00 : f32
    %20 = vector.broadcast %cst_10 : f32 to vector<8x1xf32>
    %21 = arith.maximumf %19, %20 : vector<8x1xf32>
    %22 = vector.broadcast %12 : vector<8x1xf32> to vector<8x128xf32>
    %23 = arith.subf %8, %22 : vector<8x128xf32>
    %cst_11 = arith.constant 9.99999974E-6 : f32
    %24 = vector.broadcast %cst_11 : f32 to vector<8x1xf32>
    %25 = arith.addf %21, %24 : vector<8x1xf32>
    %26 = math.rsqrt %25 : vector<8x1xf32>
    %27 = vector.broadcast %26 : vector<8x1xf32> to vector<8x128xf32>
    %28 = arith.mulf %23, %27 : vector<8x128xf32>
    %29 = vector.broadcast %0 : vector<1x128xf32> to vector<8x128xf32>
    %30 = arith.mulf %28, %29 : vector<8x128xf32>
    %31 = vector.broadcast %1 : vector<1x128xf32> to vector<8x128xf32>
    %32 = arith.addf %30, %31 : vector<8x128xf32>
    %c0_12 = arith.constant 0 : index
    %c0_13 = arith.constant 0 : index
    %33 = vector.load %arg5[%c0_12, %c0_13] : memref<1x128xf32, #tpu.memory_space<vmem>>, vector<1x128xf32>
    %cst_14 = arith.constant dense<0.000000e+00> : vector<128xf32>
    %34 = vector.multi_reduction <add>, %32, %cst_14 [0] : vector<8x128xf32> to vector<128xf32>
    %35 = vector.shape_cast %34 : vector<128xf32> to vector<1x128xf32>
    %36 = arith.addf %33, %35 : vector<1x128xf32>
    %c0_15 = arith.constant 0 : index
    %c0_16 = arith.constant 0 : index
    %37 = vector.load %arg5[%c0_15, %c0_16] : memref<1x128xf32, #tpu.memory_space<vmem>>, vector<1x128xf32>
    tpu.vector_store %arg5[%c0_15, %c0_16], %36 {strides = array<i32>} : memref<1x128xf32, #tpu.memory_space<vmem>>, vector<1x128xf32>,
    %c0_17 = arith.constant 0 : index
    %38 = arith.index_cast %5 : i32 to index
    %c0_18 = arith.constant 0 : index
    %39 = vector.load %arg4[%c0_17, %38, %c0_18] : memref<1x8x128xf32, #tpu.memory_space<vmem>>, vector<1x8x128xf32>
    %40 = vector.shape_cast %39 : vector<1x8x128xf32> to vector<8x128xf32>
    %41 = vector.shape_cast %32 : vector<8x128xf32> to vector<1x8x128xf32>
    tpu.vector_store %arg4[%c0_17, %38, %c0_18], %41 {strides = array<i32>} : memref<1x8x128xf32, #tpu.memory_space<vmem>>, vector<1x8x128xf32>,
    %c1_i32 = arith.constant 1 : i32
    %c0_19 = arith.constant 0 : index
    %c0_20 = arith.constant 0 : index
    %42 = vector.load %arg5[%c0_19, %c0_20] : memref<1x128xf32, #tpu.memory_space<vmem>>, vector<1x128xf32>
    %cst_21 = arith.constant 1.250000e-01 : f32
    %43 = vector.broadcast %cst_21 : f32 to vector<1x128xf32>
    %44 = arith.mulf %42, %43 : vector<1x128xf32>
    %c0_i32_22 = arith.constant 0 : i32
    %c8_i32_23 = arith.constant 8 : i32
    %45 = arith.muli %c0_i32_22, %c8_i32_23 : i32
    %46 = tpu.assume_multiple %45, 8 : i32
    %c0_24 = arith.constant 0 : index
    %47 = arith.index_cast %46 : i32 to index
    %c0_25 = arith.constant 0 : index
    %48 = vector.load %arg4[%c0_24, %47, %c0_25] : memref<1x8x128xf32, #tpu.memory_space<vmem>>, vector<1x8x128xf32>
    %49 = vector.shape_cast %48 : vector<1x8x128xf32> to vector<8x128xf32>
    %50 = vector.broadcast %44 : vector<1x128xf32> to vector<8x128xf32>
    %51 = arith.subf %49, %50 : vector<8x128xf32>
    %c0_26 = arith.constant 0 : index
    %52 = arith.index_cast %46 : i32 to index
    %c0_27 = arith.constant 0 : index
    %53 = vector.load %arg4[%c0_26, %52, %c0_27] : memref<1x8x128xf32, #tpu.memory_space<vmem>>, vector<1x8x128xf32>
    %54 = vector.shape_cast %53 : vector<1x8x128xf32> to vector<8x128xf32>
    %55 = vector.shape_cast %51 : vector<8x128xf32> to vector<1x8x128xf32>
    tpu.vector_store %arg4[%c0_26, %52, %c0_27], %55 {strides = array<i32>} : memref<1x8x128xf32, #tpu.memory_space<vmem>>, vector<1x8x128xf32>,
    %c1_i32_28 = arith.constant 1 : i32
    return
  }
  func.func @transform_0(%arg0: i32) -> (i32, i32, i32) {
    %c0_i32 = arith.constant 0 : i32
    %c0_i32_0 = arith.constant 0 : i32
    %c0_i32_1 = arith.constant 0 : i32
    return %arg0, %c0_i32, %c0_i32_0 : i32, i32, i32
  }
  func.func @transform_1(%arg0: i32) -> (i32, i32) {
    %c0_i32 = arith.constant 0 : i32
    %c0_i32_0 = arith.constant 0 : i32
    %c0_i32_1 = arith.constant 0 : i32
    return %c0_i32, %c0_i32_0 : i32, i32
  }
  func.func @transform_2(%arg0: i32) -> (i32, i32) {
    %c0_i32 = arith.constant 0 : i32
    %c0_i32_0 = arith.constant 0 : i32
    %c0_i32_1 = arith.constant 0 : i32
    return %c0_i32, %c0_i32_0 : i32, i32
  }
  func.func @transform_3(%arg0: i32) -> (i32, i32, i32) {
    %c0_i32 = arith.constant 0 : i32
    %c0_i32_0 = arith.constant 0 : i32
    %c0_i32_1 = arith.constant 0 : i32
    return %arg0, %c0_i32, %c0_i32_0 : i32, i32, i32
  }
}

</mosaic_0001>

<bundles_post_ra>
// kernel: tpu_custom_call.1
= control target key start
LH: loop header
LB: loop body
LE: loop exit
PB: predicated region body
PF: predicated region fallthrough
CT: control target
= control target key end

     0   :  { %8 = vsyncpa [#allocation4], 0  ;;  %s654_s0 = inlined_call_operand.hbm [shape: f32[2,8,128], index: 0, kind: input, shape index: {}]   ;;  %s655_s1 = inlined_call_operand.vmem [shape: f32[1,128], index: 1, kind: input, shape index: {}]   ;;  %s656_s2 = inlined_call_operand.vmem [shape: f32[1,128], index: 2, kind: input, shape index: {}]   ;;  %s657_s3 = inlined_call_operand.hbm [shape: f32[2,8,128], index: 3, kind: output, shape index: {}]  }
   0x1   :  { %10 = vsyncpa [#allocation4 + $0x1], 0 }
   0x2   :  { %11 = vsyncpa [#allocation5], 0 }
   0x3   :  { %13 = vsyncpa [#allocation5 + $0x1], 0  ;;  %s503_s12 = smov 0   ;;  %s505_s13 = smov 0  }
   0x4   :  { %s507_s14 = smov 0   ;;  %s509_s15 = smov 0  }
   0x5 LB: > { %s524_s16 = sadd.s32 4294967295, %s478_s15   ;;  %s323_s17 = sadd.s32 4294967294, %s478_s15   ;;  %s478_s15 = sphi %s509_s15, %s674_s15   ;;  %s474_s14 = sphi %s507_s14, %s673_s14   ;;  %s470_s13 = sphi %s505_s13, %s672_s13   ;;  %s466_s12 = sphi %s503_s12, %s671_s12  }
   0x6   : > { %s528_s18 = sadd.s32 1, %s478_s15   ;;  %s26_s19 = sadd.s32 1, %s474_s14 }
   0x7   : > { %s23_s20 = ssub.s32 %s478_s15, %s528_s18  ;;  %p33_p0 = scmp.ne.s32.totalorder %s474_s14, %s470_s13 }
   0x8   : > { %p24_p1 = scmp.eq.s32.totalorder %s23_s20, 0  ;;  %p34_p2 = scmp.eq.s32.totalorder %s478_s15, 0 }
   0x9   : > { %p39_p3 = scmp.ne.s32.totalorder %s470_s13, %s466_s12  ;;  %p40_p4 = scmp.eq.s32.totalorder %s524_s16, 0 }
   0xa   : > { %s540_s21 = scalar_select %p24_p1, %s474_s14, %s26_s19  }
   0xb   : > { %p542_p5 = por %p34_p2, %p33_p0  ;;  %p546_p6 = por %p40_p4, %p39_p3 }
   0xc   : > { %p105_p7 = scmp.eq.s32.totalorder %s524_s16, 1  ;;  %p111_p8 = scmp.eq.s32.totalorder %s323_s17, 1 }
   0xd   : > { %s661_s23 = scalar_select %p546_p6, 1, 0 }
   0xe   : > { %p349_p10 = scmp.lt.s32.totalorder %s478_s15, 2  ;;  %p553_p11 = por %p105_p7, %p33_p0 }
   0xf   : > { %p557_p12 = por %p111_p8, %p39_p3  ;;  %s137_s26 = sand.u32 1, %s474_s14  }
  0x10   : > { %s662_s24 = scalar_select %p553_p11, 1, 0 }
  0x11   : > { %s663_s25 = scalar_select %p557_p12, 1, 0 }
  0x12   : > { %s327_s27 = sshll.u32 %s478_s15, 7  ;;  %s326_s28 = sshll.u32 %s137_s26, 3 }
  0x13   : > { %s566_s4 = scalar_lea.hbm %s654_s0, %s327_s27  ;;  %s141_s5 = scalar_lea.vmem [#allocation3], %s326_s28 }
  0x14   : > { %s148_s6 = sshll.u32 %s141_s5, 4  ;;  %p570_p13 = pnand %p349_p10, %p542_p5  ;;  %s574_s6 = int_to_ptr.vmem [resolvable:$true] %s148_s6 }
  0x15   : > { %s138_s8 = scalar_lea.sflag [#allocation4], %s137_s26  ;;  %s386_s9 = scalar_lea.hbm %s566_s4, 128 }
  0x16   : > { %p387_p2 = scmp.ne.s32.totalorder %s566_s4, %s386_s9  ;;  %p388_p3 = pneg %p570_p13 }
  0x17   : > { %s391_s17 = scalar_lea.hbm %s654_s0, 256  ;;  %p392_p5 = scmp.lt.s32.totalorder %s566_s4, %s654_s0 }
  0x18   : > { %p389_p4 = pnand %p388_p3, %p387_p2  ;;  %p393_p8 = scmp.lt.s32.totalorder %s391_s17, %s386_s9 }
  0x1a   : > { %p390_p7 = pneg %p389_p4  ;;  %p394_p10 = por %p393_p8, %p392_p5 }
  0x1c   : > { %p395_p9 = pnand %p394_p10, %p390_p7 }
  0x1e   : > { %398 = shalt.err (!%p395_p9)
}
  0x1f   : > { %s399_s22 = scalar_lea.vmem %s574_s6, 128  ;;  %s480_s26 = smov [#allocation3]  }
  0x20   : > { %p400_p0 = scmp.ne.s32.totalorder %s574_s6, %s399_s22  ;;  %s404_s27 = sshll.u32 %s480_s26, 4  ;;  %s405_s27 = int_to_ptr.vmem [resolvable:$false] %s404_s27 }
  0x21   : > { %s406_s28 = scalar_lea.vmem %s405_s27, 256  ;;  %p407_p4 = scmp.lt.s32.totalorder %s574_s6, %s405_s27 }
  0x22   : > { %p402_p1 = pnand %p400_p0, %p388_p3  ;;  %p408_p12 = scmp.lt.s32.totalorder %s406_s28, %s399_s22 }
  0x24   : > { %p403_p2 = pneg %p402_p1  ;;  %p409_p11 = por %p408_p12, %p407_p4 }
  0x26   : > { %p410_p6 = pnand %p409_p11, %p403_p2 }
  0x28   : > { %413 = shalt.err (!%p410_p6)
}
  0x29   : > { %344 = dma.hbm_to_vmem [thread:$0]  (!%p570_p13), %s566_s4, 128, %s574_s6, %s138_s8  }
  0x2a   : > { %p665_p9 = scmp.lt.s32.totalorder %s478_s15, 3  ;;  %p666_p7 = scmp.ge.s32.totalorder %s478_s15, 1 }
  0x2c   : > { %p154_p0 = pnand %p666_p7, %p665_p9 }
  0x2d   : > { %s601_s29 = sand.u32 (!%p154_p0), 1, %s470_s13   ;;  %p667_p6 = scmp.ne.s32.totalorder (!%p154_p0), %s661_s23, 0 }
  0x2e   : > { %157 = sbr.rel (%p154_p0) target bundleno = 264 (0x108), region = 32  ;;  %s329_s30 = sshll.u32 (!%p154_p0), %s601_s29, 3 }
  0x2f   : > { %s160_s5 = scalar_lea.sflag (!%p154_p0), [#allocation4], %s601_s29  ;;  %s163_s7 = scalar_lea.vmem (!%p154_p0), [#allocation3], %s329_s30 }
  0x33   : > { %457 = dma.done.wait (%p667_p6), %s160_s5, 128  }
  0x34   : > { %459 = vsyncadd (%p667_p6), %s160_s5, 4294967168  ;;  %v481_v0 = vmov 0.0   ;;  %v189_v1 = vld [vmem:[%s163_s7] sm:$0xff]  ;;  %v331_v13 = vld [vmem:[%s655_s1] ss:$0 sm:$0xff]  ;;  %v232_v26 = vlaneseq  ;;  %s334_s9 = sshll.u32 %s524_s16, 7 }
  0x35   : > { %188 = vst [vmem:[#allocation2] sm:$0x1] %v481_v0  ;;  %190 = vadd.xlane.f32.xlu0 %v189_v1  ;;  %v193_v2 = vmul.f32 %v189_v1, %v189_v1  ;;  %v332_v15 = vld [vmem:[%s656_s2] ss:$0 sm:$0xff]  ;;  %s185_s10 = scalar_lea.vmem [#allocation6], %s329_s30  ;;  %s251_s20 = scalar_lea.hbm %s657_s3, %s334_s9 }
  0x36   : > { %v233_v27 = vshrl.u32 %v232_v26, 7  ;;  %s253_s11 = sshll.u32 %s185_s10, 4  ;;  %s240_s22 = scalar_lea.sflag [#allocation5], %s601_s29  ;;  %s254_s11 = int_to_ptr.vmem [resolvable:$true] %s253_s11 }
  0x37   : > { %s414_s26 = scalar_lea.vmem %s254_s11, 128  ;;  %p668_p12 = scmp.ne.s32.totalorder %s662_s24, 0 }
  0x38   : > { %v234_v28 = vsub.s32 0, %v233_v27  ;;  %p415_p11 = scmp.ne.s32.totalorder %s254_s11, %s414_s26  ;;  %s482_s27 = smov [#allocation6]  }
  0x39   : > { %194 = vadd.xlane.f32.xlu0 %v193_v2  ;;  %s418_s28 = sshll.u32 %s482_s27, 4  ;;  %s419_s28 = int_to_ptr.vmem [resolvable:$false] %s418_s28 }
  0x3a   : > { %p416_p13 = pnand %p415_p11, %p668_p12  ;;  %s420_s16 = scalar_lea.vmem %s419_s28, 256 }
  0x3b   : > { %p421_p3 = scmp.lt.s32.totalorder %s254_s11, %s419_s28  ;;  %p422_p5 = scmp.lt.s32.totalorder %s420_s16, %s414_s26 }
  0x3c   : > { %v218_v23 = vld [vmem:[#allocation2] sm:$0x1]  ;;  %p417_p1 = pneg %p416_p13 }
  0x3d   : > { %p423_p8 = por %p422_p5, %p421_p3 }
  0x3f   : > { %p424_p10 = pnand %p423_p8, %p417_p1 }
  0xbe   : > { %v191_v3 = vpop.xlane.xlu0 %190 }
  0xbf   : > { %v192_v4 = vmul.f32 0.03125, %v191_v3 }
  0xc1   : > { %v197_v6 = vmul.f32 %v192_v4, %v192_v4  ;;  %v200_v11 = vsub.f32 %v189_v1, %v192_v4 }
  0xc2   : > { %v195_v5 = vpop.xlane.xlu0 %194 }
  0xc3   : > { %v196_v7 = vmul.f32 0.03125, %v195_v5 }
  0xc5   : > { %v198_v8 = vsub.f32 %v196_v7, %v197_v6 }
  0xc7   : > { %v199_v9 = vmax.f32 %v198_v8, 0.0 }
  0xc9   : > { %v201_v10 = vadd.f32 1e-05, %v199_v9 }
  0xcb   : > { %384 = vrsqrt.f32 %v201_v10 }
  0xd8   : > { %v385_v12 = vpop.eup %384 }
  0xd9   : > { %v203_v14 = vmul.f32 %v385_v12, %v200_v11 }
  0xdb   : > { %v210_v16 = vmul.f32 %v331_v13, %v203_v14 }
  0xdd   : > { %v217_v17 = vadd.f32 %v332_v15, %v210_v16 }
  0xdf   : > { %v219_v18 = vrot.slane %v217_v17, 4 }
  0xe1   : > { %v220_v19 = vadd.f32 %v219_v18, %v217_v17 }
  0xe3   : > { %v221_v20 = vrot.slane %v220_v19, 2 }
  0xe5   : > { %v222_v21 = vadd.f32 %v221_v20, %v220_v19 }
  0xe7   : > { %v223_v22 = vrot.slane %v222_v21, 1 }
  0xe9   : > { %v224_v24 = vadd.f32 %v223_v22, %v222_v21 }
  0xeb   : > { %v225_v25 = vadd.f32 %v224_v24, %v218_v23 }
  0xed   : > { %226 = vst [vmem:[#allocation2] sm:$0x1] %v225_v25 }
  0xf4   : > { %v228_v29 = vld [vmem:[#allocation2] sm:$0x1] }
  0xf5   : > { %v229_v30 = vmul.f32 0.125, %v228_v29 }
  0xf7   : > { %v235_v31 = vrot.slane %v229_v30, %v234_v28 }
  0xf9   : > { %v237_v32 = vsub.f32 %v217_v17, %v235_v31 }
  0xfb   : > { %238 = vst [vmem:[%s185_s10] sm:$0xff] %v237_v32 }
  0xfc   : > { %427 = shalt.err (!%p424_p10)
}
  0xfd   : > { %s428_s30 = scalar_lea.hbm %s251_s20, 128  ;;  %s432_s7 = scalar_lea.hbm %s657_s3, 256 }
  0xfe   : > { %p429_p2 = scmp.ne.s32.totalorder %s251_s20, %s428_s30  ;;  %p433_p7 = scmp.lt.s32.totalorder %s251_s20, %s657_s3 }
  0xff   : > { %p434_p0 = scmp.lt.s32.totalorder %s432_s7, %s428_s30 }
 0x100   : > { %p430_p4 = pnand %p429_p2, %p668_p12 }
 0x101   : > { %p435_p6 = por %p434_p0, %p433_p7 }
 0x102   : > { %p431_p9 = pneg %p430_p4 }
 0x104   : > { %p436_p11 = pnand %p435_p6, %p431_p9 }
 0x106   : > { %439 = shalt.err (!%p436_p11)
}
 0x107   : > { %339 = dma.vmem_to_hbm [thread:$0]  (%p668_p12), %s254_s11, 128, %s251_s20, %s240_s22  }
 0x108 PF: > { %s265_s6 = sand.u32 1, %s466_s12   ;;  %p669_p13 = scmp.ne.s32.totalorder %s663_s25, 0 }
 0x109   : > { %p670_p1 = scmp.ge.s32.totalorder %s478_s15, 2  ;;  %s266_s8 = scalar_lea.sflag [#allocation5], %s265_s6 }
 0x10b   : > { %p346_p3 = pnand %p670_p1, %p669_p13 }
 0x10d   : > { %p347_p5 = pneg %p346_p3 }
 0x10f   : > { %461 = dma.done.wait (%p347_p5), %s266_s8, 128  }
 0x110   : > { %463 = vsyncadd (%p347_p5), %s266_s8, 4294967168  ;;  %p16_p8 = scmp.ge.s32.totalorder %s528_s18, 4   ;;  %s671_s12 = smov %s470_s13 }
 0x111   : > { %s672_s13 = smov %s474_s14  ;;  %s673_s14 = smov %s540_s21 }
 0x112   : > { %s674_s15 = smov %s528_s18  ;;  %18 = sbr.rel (!%p16_p8) target bundleno = 5 (0x5), region = 77 }
 0x117   :  { %271 = vsyncpa [#allocation4], 1 }
 0x118   :  { %273 = vsyncpa [#allocation4 + $0x1], 1 }
 0x119   :  { %274 = vsyncpa [#allocation5], 1 }
 0x11a   :  { %276 = vsyncpa [#allocation5 + $0x1], 1 }

</bundles_post_ra>
